<compile_context>
chip_gen: v5e
topology: v5e:2x2
jax: 0.10.0
libtpu: 0.0.40
codegen_flags: <defaults>
</compile_context>

<pallas_src>
import jax
import jax.numpy as jnp
from jax.experimental import pallas as pl
from jax.experimental.pallas import tpu as pltpu


def dueling_dqn_kernel(
    xt_ref,              # (D_in, TM)   bf16  -- batch tile lives in the lane dim
    w1t_ref, b1_ref,     # (H, D_in)    bf16, (H, 1)    f32
    wh1t_ref, bh1_ref,   # (H, H)       bf16, (H, 1)    f32   fused [wv1 | wa1]^T
    wh2t_ref, bh2_ref,   # (1+A, H)     bf16, (1+A, 1)  f32   fused blockdiag(wv2, wa2)^T
    out_ref,             # (A, TM)      f32
):
    # feature_layer: Linear -> ReLU  (Dropout = identity at inference)
    feat = jnp.dot(w1t_ref[...], xt_ref[...],
                   preferred_element_type=jnp.float32) + b1_ref[...]
    feat = jnp.maximum(feat, 0.0)                                  # (H, TM) f32

    # fused value/advantage hidden layer: Linear -> ReLU
    h = jnp.dot(wh1t_ref[...], feat.astype(jnp.bfloat16),
                preferred_element_type=jnp.float32) + bh1_ref[...]
    h = jnp.maximum(h, 0.0)                                        # (H, TM) f32

    # fused heads: one matmul gives [value ; advantages] = (1+A, TM)
    head = jnp.dot(wh2t_ref[...], h.astype(jnp.bfloat16),
                   preferred_element_type=jnp.float32) + bh2_ref[...]

    values = head[0:1, :]                                          # (1, TM)
    adv = head[1:, :]                                              # (A, TM)
    adv_mean = jnp.mean(adv, axis=0, keepdims=True)                # (1, TM)

    # q = V + (A - mean_a(A))
    out_ref[...] = (values + adv - adv_mean).astype(out_ref.dtype)


def fuse_params(p):
    """One-time prep: fuse the two streams, transpose to (out, in), cast MXU
    operands to bf16, keep biases as f32 column vectors."""
    H = p["w1"].shape[1]
    A = p["wa2"].shape[1]
    half = H // 2

    wh1 = jnp.concatenate([p["wv1"], p["wa1"]], axis=1)            # (H, H)
    bh1 = jnp.concatenate([p["bv1"], p["ba1"]], axis=1)            # (1, H)
    wh2 = jnp.concatenate(
        [jnp.concatenate([p["wv2"], jnp.zeros((half, A), jnp.float32)], axis=1),
         jnp.concatenate([jnp.zeros((half, 1), jnp.float32), p["wa2"]], axis=1)],
        axis=0)                                                    # (H, 1+A)
    bh2 = jnp.concatenate([p["bv2"], p["ba2"]], axis=1)            # (1, 1+A)

    return dict(
        w1t=p["w1"].T.astype(jnp.bfloat16),     # (H, D_in)
        b1=p["b1"].T.astype(jnp.float32),       # (H, 1)
        wh1t=wh1.T.astype(jnp.bfloat16),        # (H, H)
        bh1=bh1.T.astype(jnp.float32),          # (H, 1)
        wh2t=wh2.T.astype(jnp.bfloat16),        # (1+A, H)
        bh2=bh2.T.astype(jnp.float32),          # (1+A, 1)
    )


def dueling_dqn_forward(x, fp):
    B, D_in = x.shape
    A = fp["wh2t"].shape[0] - 1

    # Batch tile = lane dimension of every activation. >=512 rows amortize the
    # ~0.35 us per-step overhead for big batches; 128 is the minimum lane tile.
    TM = 512 if B >= 512 else 128
    B_pad = ((B + TM - 1) // TM) * TM
    grid = (B_pad // TM,)

    # Transpose once in the wrapper so the batch sits in the fast lane axis and
    # the kernel's output store is lane-dense / unmasked.
    x_pad = jnp.zeros((B_pad, D_in), x.dtype).at[:B].set(x)
    xt = x_pad.T.astype(jnp.bfloat16)                              # (D_in, B_pad)

    def resident(shape):
        return pl.BlockSpec(shape, lambda i: (0, 0))               # VMEM-resident weight

    out = pl.pallas_call(
        dueling_dqn_kernel,
        out_shape=jax.ShapeDtypeStruct((A, B_pad), jnp.float32),
        grid=grid,
        in_specs=[
            pl.BlockSpec((D_in, TM), lambda i: (0, i)),            # streamed x tile
            resident(fp["w1t"].shape), resident(fp["b1"].shape),
            resident(fp["wh1t"].shape), resident(fp["bh1"].shape),
            resident(fp["wh2t"].shape), resident(fp["bh2"].shape),
        ],
        out_specs=pl.BlockSpec((A, TM), lambda i: (0, i)),
        compiler_params=pltpu.CompilerParams(
            dimension_semantics=("parallel",)),                    # v7x: 2 TCs share batch
    )(xt, fp["w1t"], fp["b1"], fp["wh1t"], fp["bh1"], fp["wh2t"], fp["bh2"])

    return out[:, :B].T                                            # (B, A)


def init_params(key, input_dim, hidden_dim, output_dim):
    """Deterministic init mimicking PyTorch nn.Linear (U[-1/sqrt(fan_in), +])."""
    half = hidden_dim // 2

    def linear(k, fan_in, fan_out):
        kw, kb = jax.random.split(k)
        bound = 1.0 / jnp.sqrt(fan_in)
        w = jax.random.uniform(kw, (fan_in, fan_out), jnp.float32, -bound, bound)
        b = jax.random.uniform(kb, (1, fan_out), jnp.float32, -bound, bound)
        return w, b

    k1, k2, k3, k4, k5 = jax.random.split(key, 5)
    w1, b1 = linear(k1, input_dim, hidden_dim)
    wv1, bv1 = linear(k2, hidden_dim, half)
    wv2, bv2 = linear(k3, half, 1)
    wa1, ba1 = linear(k4, hidden_dim, half)
    wa2, ba2 = linear(k5, half, output_dim)
    return dict(w1=w1, b1=b1, wv1=wv1, bv1=bv1, wv2=wv2, bv2=bv2,
                wa1=wa1, ba1=ba1, wa2=wa2, ba2=ba2)


def reference_forward(x, p):
    feat = jnp.maximum(x @ p["w1"] + p["b1"], 0.0)
    vh = jnp.maximum(feat @ p["wv1"] + p["bv1"], 0.0)
    values = vh @ p["wv2"] + p["bv2"]
    ah = jnp.maximum(feat @ p["wa1"] + p["ba1"], 0.0)
    adv = ah @ p["wa2"] + p["ba2"]
    return values + (adv - jnp.mean(adv, axis=1, keepdims=True))


if __name__ == "__main__":
    input_dim, hidden_dim, output_dim = 16, 32, 4
    batch = 2

    key = jax.random.PRNGKey(0)
    kx, kp = jax.random.split(key)
    x = jax.random.normal(kx, (batch, input_dim), jnp.float32)
    params = init_params(kp, input_dim, hidden_dim, output_dim)

    fused = fuse_params(params)               # one-time weight fusion / bf16 cast
    q = dueling_dqn_forward(x, fused)
    q = jax.block_until_ready(q)

    q_ref = reference_forward(x, params)
    assert q.shape == (batch, output_dim)
    # bf16 MXU operands with f32 accumulation => looser tolerance than pure f32.
    assert jnp.allclose(q, q_ref, atol=5e-2, rtol=5e-2), (
        f"max abs err {jnp.max(jnp.abs(q - q_ref))}")

    print("KERNEL_OK")
</pallas_src>

<mosaic_0001>
module attributes {stable_mosaic.version = 11 : i64} {
  func.func @dueling_dqn_kernel(%arg0: i32, %arg1: memref<16x128xbf16, #tpu.memory_space<vmem>>, %arg2: memref<32x16xbf16, #tpu.memory_space<vmem>>, %arg3: memref<32x1xf32, #tpu.memory_space<vmem>>, %arg4: memref<32x32xbf16, #tpu.memory_space<vmem>>, %arg5: memref<32x1xf32, #tpu.memory_space<vmem>>, %arg6: memref<5x32xbf16, #tpu.memory_space<vmem>>, %arg7: memref<5x1xf32, #tpu.memory_space<vmem>>, %arg8: memref<4x128xf32, #tpu.memory_space<vmem>>) attributes {dimension_semantics = [#tpu.dimension_semantics<parallel>], iteration_bounds = array<i64: 1>, scalar_prefetch = 0 : i64, scratch_operands = 0 : i64, tpu.core_type = #tpu.core_type<tc>, window_params = [{transform_indices = @transform_0, window_bounds = array<i64: 16, 128>}, {pipeline_mode = #tpu.pipeline_mode<synchronous>, transform_indices = @transform_1, window_bounds = array<i64: 32, 16>}, {pipeline_mode = #tpu.pipeline_mode<synchronous>, transform_indices = @transform_2, window_bounds = array<i64: 32, 1>}, {pipeline_mode = #tpu.pipeline_mode<synchronous>, transform_indices = @transform_3, window_bounds = array<i64: 32, 32>}, {pipeline_mode = #tpu.pipeline_mode<synchronous>, transform_indices = @transform_4, window_bounds = array<i64: 32, 1>}, {pipeline_mode = #tpu.pipeline_mode<synchronous>, transform_indices = @transform_5, window_bounds = array<i64: 5, 32>}, {pipeline_mode = #tpu.pipeline_mode<synchronous>, transform_indices = @transform_6, window_bounds = array<i64: 5, 1>}, {transform_indices = @transform_7, window_bounds = array<i64: 4, 128>}]} {
    %c0 = arith.constant 0 : index
    %c0_0 = arith.constant 0 : index
    %0 = vector.load %arg2[%c0, %c0_0] : memref<32x16xbf16, #tpu.memory_space<vmem>>, vector<32x16xbf16>
    %c0_1 = arith.constant 0 : index
    %c0_2 = arith.constant 0 : index
    %1 = vector.load %arg1[%c0_1, %c0_2] : memref<16x128xbf16, #tpu.memory_space<vmem>>, vector<16x128xbf16>
    %cst = arith.constant dense<0.000000e+00> : vector<32x128xf32>
    %2 = tpu.matmul %0, %1, %cst {dimension_numbers = #tpu.dot_dimension_numbers<[1], [0], [0], [1], [0, 0, 1, 1], [], []>} : vector<32x16xbf16>, vector<16x128xbf16>, vector<32x128xf32> -> vector<32x128xf32>
    %c0_3 = arith.constant 0 : index
    %c0_4 = arith.constant 0 : index
    %3 = vector.load %arg3[%c0_3, %c0_4] : memref<32x1xf32, #tpu.memory_space<vmem>>, vector<32x1xf32>
    %4 = vector.broadcast %3 : vector<32x1xf32> to vector<32x128xf32>
    %5 = arith.addf %2, %4 : vector<32x128xf32>
    %cst_5 = arith.constant 0.000000e+00 : f32
    %6 = vector.broadcast %cst_5 : f32 to vector<32x128xf32>
    %7 = arith.maximumf %5, %6 : vector<32x128xf32>
    %c0_6 = arith.constant 0 : index
    %c0_7 = arith.constant 0 : index
    %8 = vector.load %arg4[%c0_6, %c0_7] : memref<32x32xbf16, #tpu.memory_space<vmem>>, vector<32x32xbf16>
    %9 = arith.truncf %7 : vector<32x128xf32> to vector<32x128xbf16>
    %cst_8 = arith.constant dense<0.000000e+00> : vector<32x128xf32>
    %10 = tpu.matmul %8, %9, %cst_8 {dimension_numbers = #tpu.dot_dimension_numbers<[1], [0], [0], [1], [0, 0, 1, 1], [], []>} : vector<32x32xbf16>, vector<32x128xbf16>, vector<32x128xf32> -> vector<32x128xf32>
    %c0_9 = arith.constant 0 : index
    %c0_10 = arith.constant 0 : index
    %11 = vector.load %arg5[%c0_9, %c0_10] : memref<32x1xf32, #tpu.memory_space<vmem>>, vector<32x1xf32>
    %12 = vector.broadcast %11 : vector<32x1xf32> to vector<32x128xf32>
    %13 = arith.addf %10, %12 : vector<32x128xf32>
    %cst_11 = arith.constant 0.000000e+00 : f32
    %14 = vector.broadcast %cst_11 : f32 to vector<32x128xf32>
    %15 = arith.maximumf %13, %14 : vector<32x128xf32>
    %c0_12 = arith.constant 0 : index
    %c0_13 = arith.constant 0 : index
    %16 = vector.load %arg6[%c0_12, %c0_13] : memref<5x32xbf16, #tpu.memory_space<vmem>>, vector<5x32xbf16>
    %17 = arith.truncf %15 : vector<32x128xf32> to vector<32x128xbf16>
    %cst_14 = arith.constant dense<0.000000e+00> : vector<5x128xf32>
    %18 = tpu.matmul %16, %17, %cst_14 {dimension_numbers = #tpu.dot_dimension_numbers<[1], [0], [0], [1], [0, 0, 1, 1], [], []>} : vector<5x32xbf16>, vector<32x128xbf16>, vector<5x128xf32> -> vector<5x128xf32>
    %c0_15 = arith.constant 0 : index
    %c0_16 = arith.constant 0 : index
    %19 = vector.load %arg7[%c0_15, %c0_16] : memref<5x1xf32, #tpu.memory_space<vmem>>, vector<5x1xf32>
    %20 = vector.broadcast %19 : vector<5x1xf32> to vector<5x128xf32>
    %21 = arith.addf %18, %20 : vector<5x128xf32>
    %22 = vector.extract_strided_slice %21 {offsets = [0, 0], sizes = [1, 128], strides = [1, 1]} : vector<5x128xf32> to vector<1x128xf32>
    %23 = vector.extract_strided_slice %21 {offsets = [1, 0], sizes = [4, 128], strides = [1, 1]} : vector<5x128xf32> to vector<4x128xf32>
    %cst_17 = arith.constant dense<0.000000e+00> : vector<128xf32>
    %24 = vector.multi_reduction <add>, %23, %cst_17 [0] : vector<4x128xf32> to vector<128xf32>
    %25 = vector.shape_cast %24 : vector<128xf32> to vector<1x128xf32>
    %cst_18 = arith.constant 4.000000e+00 : f32
    %26 = vector.broadcast %cst_18 : f32 to vector<1x128xf32>
    %27 = arith.divf %25, %26 : vector<1x128xf32>
    %28 = vector.broadcast %22 : vector<1x128xf32> to vector<4x128xf32>
    %29 = arith.addf %28, %23 : vector<4x128xf32>
    %30 = vector.broadcast %27 : vector<1x128xf32> to vector<4x128xf32>
    %31 = arith.subf %29, %30 : vector<4x128xf32>
    %c0_19 = arith.constant 0 : index
    %c0_20 = arith.constant 0 : index
    %32 = vector.load %arg8[%c0_19, %c0_20] : memref<4x128xf32, #tpu.memory_space<vmem>>, vector<4x128xf32>
    tpu.vector_store %arg8[%c0_19, %c0_20], %31 {strides = array<i32>} : memref<4x128xf32, #tpu.memory_space<vmem>>, vector<4x128xf32>,
    return
  }
  func.func @transform_0(%arg0: i32) -> (i32, i32) {
    %c0_i32 = arith.constant 0 : i32
    %c0_i32_0 = arith.constant 0 : i32
    return %c0_i32, %arg0 : i32, i32
  }
  func.func @transform_1(%arg0: i32) -> (i32, i32) {
    %c0_i32 = arith.constant 0 : i32
    %c0_i32_0 = arith.constant 0 : i32
    %c0_i32_1 = arith.constant 0 : i32
    return %c0_i32, %c0_i32_0 : i32, i32
  }
  func.func @transform_2(%arg0: i32) -> (i32, i32) {
    %c0_i32 = arith.constant 0 : i32
    %c0_i32_0 = arith.constant 0 : i32
    %c0_i32_1 = arith.constant 0 : i32
    return %c0_i32, %c0_i32_0 : i32, i32
  }
  func.func @transform_3(%arg0: i32) -> (i32, i32) {
    %c0_i32 = arith.constant 0 : i32
    %c0_i32_0 = arith.constant 0 : i32
    %c0_i32_1 = arith.constant 0 : i32
    return %c0_i32, %c0_i32_0 : i32, i32
  }
  func.func @transform_4(%arg0: i32) -> (i32, i32) {
    %c0_i32 = arith.constant 0 : i32
    %c0_i32_0 = arith.constant 0 : i32
    %c0_i32_1 = arith.constant 0 : i32
    return %c0_i32, %c0_i32_0 : i32, i32
  }
  func.func @transform_5(%arg0: i32) -> (i32, i32) {
    %c0_i32 = arith.constant 0 : i32
    %c0_i32_0 = arith.constant 0 : i32
    %c0_i32_1 = arith.constant 0 : i32
    return %c0_i32, %c0_i32_0 : i32, i32
  }
  func.func @transform_6(%arg0: i32) -> (i32, i32) {
    %c0_i32 = arith.constant 0 : i32
    %c0_i32_0 = arith.constant 0 : i32
    %c0_i32_1 = arith.constant 0 : i32
    return %c0_i32, %c0_i32_0 : i32, i32
  }
  func.func @transform_7(%arg0: i32) -> (i32, i32) {
    %c0_i32 = arith.constant 0 : i32
    %c0_i32_0 = arith.constant 0 : i32
    return %c0_i32, %arg0 : i32, i32
  }
}

</mosaic_0001>

<bundles_post_ra>
// kernel: tpu_custom_call.1
= control target key start
LH: loop header
LB: loop body
LE: loop exit
PB: predicated region body
PF: predicated region fallthrough
CT: control target
= control target key end

     0   :  { %v304_v3 = vmov 0   ;;  %vm74_vm0 = vcmask 130048   ;;  %s398_s0 = inlined_call_operand.vmem [shape: bf16[16,128], index: 0, kind: input, shape index: {}]   ;;  %s399_s1 = inlined_call_operand.vmem [shape: bf16[32,16], index: 1, kind: input, shape index: {}]   ;;  %s400_s2 = inlined_call_operand.vmem [shape: f32[32,1], index: 2, kind: input, shape index: {}]   ;;  %s401_s3 = inlined_call_operand.vmem [shape: bf16[32,32], index: 3, kind: input, shape index: {}]   ;;  %s402_s4 = inlined_call_operand.vmem [shape: f32[32,1], index: 4, kind: input, shape index: {}]   ;;  %s403_s5 = inlined_call_operand.vmem [shape: bf16[5,32], index: 5, kind: input, shape index: {}]   ;;  %s404_s6 = inlined_call_operand.vmem [shape: f32[5,1], index: 6, kind: input, shape index: {}]   ;;  %s405_s7 = inlined_call_operand.hbm [shape: f32[4,128], index: 7, kind: output, shape index: {}]  }
   0x1   :  { %v265_v0 = vld [vmem:[%s398_s0] sm:$0xff]  ;;  %v36_v1 = vld [vmem:[%s400_s2 + $0x10] sm:$0xff]  ;;  %274 = vset.pattern.permute.xlu1 %v304_v3  ;;  %273 = vset.pattern.permute.xlu0 %v304_v3 }
   0x2   :  { %v263_v2 = vld [vmem:[%s399_s1] sm:$0xff]  ;;  %88 = vmatpush.bf16.msra.mxu0 %v265_v0  ;;  %50 = vperm.xlu0 %273, %v36_v1  }
   0x3   :  { %v34_v4 = vld [vmem:[%s400_s2] sm:$0xff]  ;;  %275 = vset.pattern.permute.xlu2 %v304_v3 }
   0x4   :  { %40 = vperm.xlu1 %274, %v34_v4  }
   0x5   :  { %12 = vsyncpa [#allocation3], 0  ;;  %250 = vmatmul.msk.bf16.vlgmr.msra.gmra.mxu0 %vm74_vm0, %v263_v2  ;;  %v37_v5 = vld [vmem:[%s400_s2 + $0x18] sm:$0xff]  ;;  %v35_v6 = vld [vmem:[%s400_s2 + $0x8] sm:$0xff]  ;;  %vm144_vm1 = vcmask 261120   ;;  %v305_v52 = vmov 4.0  }
   0x6   :  { %v110_v7 = vld [vmem:[%s402_s4] sm:$0xff]  ;;  %v111_v8 = vld [vmem:[%s402_s4 + $0x8] sm:$0xff]  ;;  %v112_v11 = vld [vmem:[%s402_s4 + $0x10] sm:$0xff]  ;;  %276 = vrcp.f32 %v305_v52  ;;  %vm202_vm2 = vcmask 1043456   ;;  %s229_s28 = sshll.u32 %s405_s7, 4  ;;  %s230_s28 = int_to_ptr.hbm [resolvable:$true] %s229_s28 }
   0x7   :  { %v264_v9 = vld [vmem:[%s399_s1 + $0x8] sm:$0xff]  ;;  %126 = vperm.xlu2 %275, %v112_v11   ;;  %v113_v14 = vld [vmem:[%s402_s4 + $0x18] sm:$0xff]  ;;  %v177_v17 = vld [vmem:[%s404_s6] sm:$0x1f] }
   0x8   :  { %v266_v31 = vld [vmem:[%s401_s3] sm:$0xff]  ;;  %v267_v32 = vld [vmem:[%s401_s3 + $0x8] sm:$0xff] }
   0x9   :  { %v174_v51 = vld [vmem:[%s403_s5] sm:$0x7]  ;;  %s306_s5 = smov [#allocation2]  }
   0xa   :  { %55 = vperm.xlu0 %273, %v37_v5   ;;  %s227_s25 = sshll.u32 %s306_s5, 4  ;;  %s228_s25 = int_to_ptr.vmem [resolvable:$true] %s227_s25 }
   0xc   :  { %45 = vperm.xlu1 %274, %v35_v6   ;;  %v277_v53 = vpop.eup %276 }
   0xd   :  { %v211_v54 = vmul.f32 4.0, %v277_v53  ;;  %vm215_vm3 = vweird.f32 %v277_v53 }
   0xf   :  { %131 = vperm.xlu2 %275, %v113_v14   ;;  %v212_v59 = vsub.f32 1.0, %v211_v54 }
  0x11   :  { %v213_v62 = vmul.f32 %v277_v53, %v212_v59 }
  0x12   :  { %116 = vperm.xlu0 %273, %v110_v7  }
  0x13   :  { %v214_v2 = vadd.f32 %v277_v53, %v213_v62 }
  0x14   :  { %121 = vperm.xlu1 %274, %v111_v8  }
  0x15   :  { %251 = vmatmul.msk.bf16.gmra.mxu0 %vm74_vm0, %v264_v9  ;;  %v216_v6 = vsel %vm215_vm3, %v277_v53, %v214_v2 }
  0x17   :  { %180 = vperm.xlu2 %275, %v177_v17  }
  0x61   :  { %v127_v34 = vpop.permute.xlu2 %126 }
  0x69   :  { %v132_v39 = vpop.permute.xlu2 %131 }
  0x71   :  { %v181_v55 = vpop.permute.xlu2 %180 }
  0x74   :  { %v51_v15 = vpop.permute.xlu0 %50 }
  0x76   :  { %v41_v13 = vpop.permute.xlu1 %40 }
  0x7c   :  { %v56_v20 = vpop.permute.xlu0 %55 }
  0x7e   :  { %v46_v18 = vpop.permute.xlu1 %45 }
  0x82   :  { %v90_v10 = vpop.f32.mrf.mxu0 }
  0x83   :  { %v91_v24 = vadd.f32 %v90_v10, %v41_v13 }
  0x84   :  { %v117_v43 = vpop.permute.xlu0 %116 }
  0x85   :  { %v100_v29 = vmax.f32 %v91_v24, 0.0 }
  0x86   :  { %v122_v37 = vpop.permute.xlu1 %121 }
  0x8a   :  { %v92_v12 = vpop.f32.mrf.mxu0 }
  0x8b   :  { %v93_v22 = vadd.f32 %v92_v12, %v46_v18 }
  0x8d   :  { %v101_v27 = vmax.f32 %v93_v22, 0.0 }
  0x8f   :  { %v108_v30 = vpack.c.bf16 %v101_v27, %v100_v29 }
  0x92   :  { %v95_v16 = vpop.f32.mrf.mxu0 }
  0x93   :  { %v96_v19 = vadd.f32 %v95_v16, %v51_v15 }
  0x95   :  { %v102_v25 = vmax.f32 %v96_v19, 0.0 }
  0x9a   :  { %v97_v21 = vpop.f32.mrf.mxu0 }
  0x9b   :  { %v98_v23 = vadd.f32 %v97_v21, %v56_v20 }
  0x9d   :  { %v103_v26 = vmax.f32 %v98_v23, 0.0 }
  0x9f   :  { %v109_v28 = vpack.c.bf16 %v103_v26, %v102_v25 }
  0xa1   :  { %157 = vmatpush.bf16.msra.mxu1 %v109_v28  ;;  %268 = vmatpush.bf16.msra.mxu3 %v109_v28 }
  0xa5   :  { %158 = vmatpush.bf16.msra.mxu1 %v108_v30  ;;  %269 = vmatpush.bf16.msra.mxu3 %v108_v30 }
  0xa8   :  { %260 = vmatmul.msk.bf16.vlgmr.msra.gmra.mxu1 %vm144_vm1, %v266_v31  ;;  %261 = vmatmul.msk.bf16.vlgmr.msra.gmra.mxu3 %vm144_vm1, %v267_v32 }
 0x125   :  { %v160_v33 = vpop.f32.mrf.mxu1 }
 0x126   :  { %v161_v44 = vadd.f32 %v160_v33, %v117_v43 }
 0x128   :  { %v170_v49 = vmax.f32 %v161_v44, 0.0 }
 0x12b   :  { %v165_v35 = vpop.f32.mrf.mxu3 }
 0x12c   :  { %v166_v38 = vadd.f32 %v165_v35, %v127_v34 }
 0x12d   :  { %v162_v36 = vpop.f32.mrf.mxu1 }
 0x12e   :  { %v163_v41 = vadd.f32 %v162_v36, %v122_v37  ;;  %v172_v45 = vmax.f32 %v166_v38, 0.0 }
 0x130   :  { %v171_v47 = vmax.f32 %v163_v41, 0.0 }
 0x132   :  { %v175_v50 = vpack.c.bf16 %v171_v47, %v170_v49 }
 0x133   :  { %v167_v40 = vpop.f32.mrf.mxu3 }
 0x134   :  { %v168_v42 = vadd.f32 %v167_v40, %v132_v39 }
 0x136   :  { %v173_v46 = vmax.f32 %v168_v42, 0.0 }
 0x138   :  { %v176_v48 = vpack.c.bf16 %v173_v46, %v172_v45 }
 0x13a   :  { %192 = vmatpush.bf16.msra.mxu2 %v176_v48 }
 0x13e   :  { %193 = vmatpush.bf16.msra.mxu2 %v175_v50 }
 0x141   :  { %262 = vmatmul.msk.bf16.vlgmr.msra.gmra.mxu2 %vm144_vm1, %v174_v51 }
 0x1c4   :  { %v195_v56 = vpop.f32.mrf.mxu2 }
 0x1c5   :  { %v196_v57 = vadd.f32 %v195_v56, %v181_v55 }
 0x1c7   :  { %v200_v58 = vrot.slane %v196_v57, 1  ;;  %v218_v4 = vperm.slane %v196_v57, 0 }
 0x1c9   :  { %v203_v60 = vsel %vm202_vm2, %v200_v58, 0.0  ;;  %v219_v8 = vadd.f32 %v218_v4, %v196_v57 }
 0x1ca   :  { %v204_v61 = vrot.slane %v203_v60, 4 }
 0x1cc   :  { %v205_v63 = vadd.f32 %v204_v61, %v203_v60  ;;  %v197_v0 = vpop.f32.mrf.mxu2 }
 0x1ce   :  { %v206_v1 = vrot.slane %v205_v63, 2 }
 0x1d0   :  { %v207_v3 = vadd.f32 %v206_v1, %v205_v63 }
 0x1d2   :  { %v208_v5 = vrot.slane %v207_v3, 1 }
 0x1d4   :  { %v209_v7 = vadd.f32 %v208_v5, %v207_v3 }
 0x1d6   :  { %v217_v9 = vmul.f32 %v216_v6, %v209_v7 }
 0x1d8   :  { %v220_v10 = vsub.f32 %v219_v8, %v217_v9 }
 0x1da   :  { %221 = vst [vmem:[#allocation2 - $0x1] sm:$0x1e] %v220_v10 }
 0x1db   :  { %232 = dma.vmem_to_hbm [thread:$0]  %s228_s25, 64, %s230_s28, [#allocation3]  }
 0x1dc   :  { %302 = dma.done.wait [#allocation3], 64  }
 0x1dd   :  { %303 = vsyncadd [#allocation3], 4294967232 }
 0x1de   :  { %237 = vsyncpa [#allocation3], 1 }

</bundles_post_ra>
